<compile_context>
chip_gen: v6e
topology: v6e:2x2x1
jax: 0.10.0
libtpu: 0.0.40
codegen_flags: <defaults>
</compile_context>

<pallas_src>
import functools

import jax
import jax.numpy as jnp
from jax.experimental import pallas as pl
from jax.experimental.pallas import tpu as pltpu


_TILE_B = 512          # max batch tile (rows); multiple of 16 (bf16 sublane packing)
_LANE = 128            # output lane alignment


def _round_up(n, m):
    return ((n + m - 1) // m) * m


def _mlp_multihead_kernel(x_ref, w1_ref, b1_ref, w2_ref, b2_ref,
                          wh_ref, bh_ref, o_ref):
    """Fused forward: two hidden Linear+ReLU layers + all (padded) task heads.

    x_ref  : [TB, D_in]    f32 input tile (cast to bf16 in-kernel)
    w1_ref : [D_in, H]     bf16
    b1_ref : [1, H]        f32
    w2_ref : [H, H]        bf16
    b2_ref : [1, H]        f32
    wh_ref : [H, O_pad]    bf16 (all task heads concatenated, zero padded)
    bh_ref : [1, O_pad]    f32
    o_ref  : [TB, O_pad]   bf16 output tile
    """
    x = x_ref[...].astype(jnp.bfloat16)   # in-kernel cast: no separate HBM cast pass
    # bf16 MXU matmuls with f32 accumulation; bias/ReLU in f32.
    h1 = jnp.dot(x, w1_ref[...], preferred_element_type=jnp.float32) + b1_ref[...]
    h1 = jnp.maximum(h1, 0.0).astype(jnp.bfloat16)
    h2 = jnp.dot(h1, w2_ref[...], preferred_element_type=jnp.float32) + b2_ref[...]
    h2 = jnp.maximum(h2, 0.0).astype(jnp.bfloat16)
    out = jnp.dot(h2, wh_ref[...], preferred_element_type=jnp.float32) + bh_ref[...]
    o_ref[...] = out.astype(o_ref.dtype)


@functools.partial(jax.jit, static_argnames=("tb",))
def _forward_2d(x2d, w1, b1, w2, b2, wh, bh, *, tb):
    """x2d: [B_pad, d_in] f32 (B_pad a multiple of tb). Returns [B_pad, O_pad] bf16."""
    b_pad, d_in = x2d.shape
    h = w1.shape[1]
    o_pad = wh.shape[1]
    grid = (pl.cdiv(b_pad, tb),)

    # VMEM budget derived from actual tile sizes:
    #   streamed x (2 bufs, f32) + streamed out (2 bufs, bf16)
    #   + single-buffered resident weights + in-kernel activation headroom.
    resident = (d_in * h + h * h + h * o_pad) * 2 + (2 * h + o_pad) * 4
    streamed = 2 * tb * d_in * 4 + 2 * tb * o_pad * 2
    activ = tb * d_in * 2 + 2 * tb * h * (4 + 2) + tb * o_pad * 4
    vmem_limit = min(max(int((resident + streamed + activ) * 3 // 2) + (2 << 20),
                         8 << 20), 48 << 20)

    def resident_spec(shape):
        # constant index map -> single buffer (no point double-buffering)
        return pl.BlockSpec(shape, lambda i: (0, 0), pipeline_mode=pl.Buffered(1))

    return pl.pallas_call(
        _mlp_multihead_kernel,
        out_shape=jax.ShapeDtypeStruct((b_pad, o_pad), jnp.bfloat16),
        grid_spec=pl.GridSpec(
            grid=grid,
            in_specs=[
                pl.BlockSpec((tb, d_in), lambda i: (i, 0)),   # x: pipelined per tile
                resident_spec((d_in, h)),                     # weights: VMEM-resident
                resident_spec((1, h)),
                resident_spec((h, h)),
                resident_spec((1, h)),
                resident_spec((h, o_pad)),
                resident_spec((1, o_pad)),
            ],
            out_specs=pl.BlockSpec((tb, o_pad), lambda i: (i, 0)),
        ),
        compiler_params=pltpu.CompilerParams(
            dimension_semantics=("parallel",),
            vmem_limit_bytes=vmem_limit,
        ),
    )(x2d, w1, b1, w2, b2, wh, bh)


class NormalNNPallas:
    """JAX/Pallas re-implementation of NormalNN's forward pass (multi-head MLP)."""

    def __init__(self, in_shape, hidden, out_dim, key):
        # out_dim: dict {task_name: dim}, mirroring agent_config['out_dim']
        self.in_shape = in_shape                      # (C, H, W)
        self.d_in = int(in_shape[0] * in_shape[1] * in_shape[2])
        self.hidden = hidden
        self.tasks = list(out_dim.keys())
        self.out_dims = [out_dim[t] for t in self.tasks]
        self.o_total = sum(self.out_dims)
        self.o_pad = _round_up(max(self.o_total, _LANE), _LANE)

        def linear_init(k, fan_in, fan_out):
            # matches PyTorch nn.Linear default: U(-1/sqrt(fan_in), 1/sqrt(fan_in))
            kw, kb = jax.random.split(k)
            bound = 1.0 / jnp.sqrt(jnp.float32(fan_in))
            w = jax.random.uniform(kw, (fan_in, fan_out), jnp.float32, -bound, bound)
            b = jax.random.uniform(kb, (1, fan_out), jnp.float32, -bound, bound)
            return w, b

        k1, k2, k3 = jax.random.split(key, 3)
        w1, self.b1 = linear_init(k1, self.d_in, hidden)
        w2, self.b2 = linear_init(k2, hidden, hidden)
        # per-task heads, concatenated along the output dim, padded to o_pad lanes
        head_keys = jax.random.split(k3, len(self.tasks))
        whs, bhs = [], []
        for hk, od in zip(head_keys, self.out_dims):
            w, b = linear_init(hk, hidden, od)
            whs.append(w)
            bhs.append(b)
        wh = jnp.concatenate(whs, axis=1)
        bh = jnp.concatenate(bhs, axis=1)
        pad = self.o_pad - self.o_total
        wh = jnp.pad(wh, ((0, 0), (0, pad)))
        bh = jnp.pad(bh, ((0, 0), (0, pad)))

        # Matmul operands in bf16 (MXU-native on all generations); biases stay f32.
        self.w1 = w1.astype(jnp.bfloat16)
        self.w2 = w2.astype(jnp.bfloat16)
        self.wh = wh.astype(jnp.bfloat16)
        self.bh = bh

    def _tile(self, B):
        """Pick (tb, b_pad): tb multiple of 16, >=2 grid steps for large B."""
        b16 = _round_up(max(B, 16), 16)
        if b16 <= _TILE_B:
            tb = b16
        else:
            n_tiles = -(-b16 // _TILE_B)
            tb = _round_up(-(-b16 // n_tiles), 16)
        return tb, _round_up(b16, tb)

    def forward(self, x):
        # x: NCHW [B, C, H, W]  (PyTorch convention)
        B = x.shape[0]
        # No wrapper-side bf16 cast: the kernel reads f32 and casts in VMEM.
        x2d = x.reshape(B, self.d_in).astype(jnp.float32)

        tb, b_pad = self._tile(B)
        if b_pad != B:
            # TODO(synk): fold this pad into the kernel / use a ragged final tile
            #             to avoid one extra HBM pass over x.
            x2d = jnp.pad(x2d, ((0, b_pad - B), (0, 0)))

        out = _forward_2d(x2d, self.w1, self.b1, self.w2, self.b2,
                          self.wh, self.bh, tb=tb)

        # slice per-task views directly from the padded kernel output
        result = {}
        off = 0
        for t, od in zip(self.tasks, self.out_dims):
            result[t] = out[:B, off:off + od]
            off += od
        return result


def _reference_forward(model, x):
    B = x.shape[0]
    x2d = x.reshape(B, model.d_in).astype(jnp.bfloat16)
    h1 = jnp.maximum(
        jnp.dot(x2d, model.w1, preferred_element_type=jnp.float32) + model.b1, 0.0
    ).astype(jnp.bfloat16)
    h2 = jnp.maximum(
        jnp.dot(h1, model.w2, preferred_element_type=jnp.float32) + model.b2, 0.0
    ).astype(jnp.bfloat16)
    out = jnp.dot(h2, model.wh, preferred_element_type=jnp.float32) + model.bh
    out = out[:, :model.o_total]
    res, off = {}, 0
    for t, od in zip(model.tasks, model.out_dims):
        res[t] = out[:, off:off + od]
        off += od
    return res


if __name__ == "__main__":
    key = jax.random.PRNGKey(0)
    k_param, k_x = jax.random.split(key)

    # small, module-consistent shapes: batch=8, single-channel 16x16 "images",
    # hidden=128, two task heads of 10 classes each (multihead=True).
    in_shape = (1, 16, 16)
    out_dim = {"1": 10, "2": 10}
    model = NormalNNPallas(in_shape, hidden=128, out_dim=out_dim, key=k_param)

    x = jax.random.normal(k_x, (8,) + in_shape, dtype=jnp.float32)

    out = model.forward(x)
    out = jax.tree_util.tree_map(jax.block_until_ready, out)

    ref = _reference_forward(model, x)
    for t in out:
        assert out[t].shape == ref[t].shape, f"shape mismatch for task {t}"
        assert jnp.allclose(out[t].astype(jnp.float32), ref[t],
                            atol=2e-2, rtol=2e-2), f"mismatch for task {t}"

    print("KERNEL_OK")
</pallas_src>

<mosaic_0001>
module attributes {stable_mosaic.version = 11 : i64} {
  func.func @_mlp_multihead_kernel(%arg0: i32, %arg1: memref<16x256xf32, #tpu.memory_space<vmem>>, %arg2: memref<256x128xbf16, #tpu.memory_space<vmem>>, %arg3: memref<1x128xf32, #tpu.memory_space<vmem>>, %arg4: memref<128x128xbf16, #tpu.memory_space<vmem>>, %arg5: memref<1x128xf32, #tpu.memory_space<vmem>>, %arg6: memref<128x128xbf16, #tpu.memory_space<vmem>>, %arg7: memref<1x128xf32, #tpu.memory_space<vmem>>, %arg8: memref<16x128xbf16, #tpu.memory_space<vmem>>) attributes {dimension_semantics = [#tpu.dimension_semantics<parallel>], iteration_bounds = array<i64: 1>, scalar_prefetch = 0 : i64, scratch_operands = 0 : i64, tpu.core_type = #tpu.core_type<tc>, window_params = [{transform_indices = @transform_0, window_bounds = array<i64: 16, 256>}, {pipeline_mode = #tpu.pipeline_mode<synchronous>, transform_indices = @transform_1, window_bounds = array<i64: 256, 128>}, {pipeline_mode = #tpu.pipeline_mode<synchronous>, transform_indices = @transform_2, window_bounds = array<i64: 1, 128>}, {pipeline_mode = #tpu.pipeline_mode<synchronous>, transform_indices = @transform_3, window_bounds = array<i64: 128, 128>}, {pipeline_mode = #tpu.pipeline_mode<synchronous>, transform_indices = @transform_4, window_bounds = array<i64: 1, 128>}, {pipeline_mode = #tpu.pipeline_mode<synchronous>, transform_indices = @transform_5, window_bounds = array<i64: 128, 128>}, {pipeline_mode = #tpu.pipeline_mode<synchronous>, transform_indices = @transform_6, window_bounds = array<i64: 1, 128>}, {transform_indices = @transform_7, window_bounds = array<i64: 16, 128>}]} {
    %c0 = arith.constant 0 : index
    %c0_0 = arith.constant 0 : index
    %0 = vector.load %arg1[%c0, %c0_0] : memref<16x256xf32, #tpu.memory_space<vmem>>, vector<16x256xf32>
    %1 = arith.truncf %0 : vector<16x256xf32> to vector<16x256xbf16>
    %c0_1 = arith.constant 0 : index
    %c0_2 = arith.constant 0 : index
    %2 = vector.load %arg2[%c0_1, %c0_2] : memref<256x128xbf16, #tpu.memory_space<vmem>>, vector<256x128xbf16>
    %cst = arith.constant dense<0.000000e+00> : vector<16x128xf32>
    %3 = tpu.matmul %1, %2, %cst {dimension_numbers = #tpu.dot_dimension_numbers<[1], [0], [0], [1], [0, 0, 1, 1], [], []>} : vector<16x256xbf16>, vector<256x128xbf16>, vector<16x128xf32> -> vector<16x128xf32>
    %c0_3 = arith.constant 0 : index
    %c0_4 = arith.constant 0 : index
    %4 = vector.load %arg3[%c0_3, %c0_4] : memref<1x128xf32, #tpu.memory_space<vmem>>, vector<1x128xf32>
    %5 = vector.broadcast %4 : vector<1x128xf32> to vector<16x128xf32>
    %6 = arith.addf %3, %5 : vector<16x128xf32>
    %cst_5 = arith.constant 0.000000e+00 : f32
    %7 = vector.broadcast %cst_5 : f32 to vector<16x128xf32>
    %8 = arith.maximumf %6, %7 : vector<16x128xf32>
    %9 = arith.truncf %8 : vector<16x128xf32> to vector<16x128xbf16>
    %c0_6 = arith.constant 0 : index
    %c0_7 = arith.constant 0 : index
    %10 = vector.load %arg4[%c0_6, %c0_7] : memref<128x128xbf16, #tpu.memory_space<vmem>>, vector<128x128xbf16>
    %cst_8 = arith.constant dense<0.000000e+00> : vector<16x128xf32>
    %11 = tpu.matmul %9, %10, %cst_8 {dimension_numbers = #tpu.dot_dimension_numbers<[1], [0], [0], [1], [0, 0, 1, 1], [], []>} : vector<16x128xbf16>, vector<128x128xbf16>, vector<16x128xf32> -> vector<16x128xf32>
    %c0_9 = arith.constant 0 : index
    %c0_10 = arith.constant 0 : index
    %12 = vector.load %arg5[%c0_9, %c0_10] : memref<1x128xf32, #tpu.memory_space<vmem>>, vector<1x128xf32>
    %13 = vector.broadcast %12 : vector<1x128xf32> to vector<16x128xf32>
    %14 = arith.addf %11, %13 : vector<16x128xf32>
    %cst_11 = arith.constant 0.000000e+00 : f32
    %15 = vector.broadcast %cst_11 : f32 to vector<16x128xf32>
    %16 = arith.maximumf %14, %15 : vector<16x128xf32>
    %17 = arith.truncf %16 : vector<16x128xf32> to vector<16x128xbf16>
    %c0_12 = arith.constant 0 : index
    %c0_13 = arith.constant 0 : index
    %18 = vector.load %arg6[%c0_12, %c0_13] : memref<128x128xbf16, #tpu.memory_space<vmem>>, vector<128x128xbf16>
    %cst_14 = arith.constant dense<0.000000e+00> : vector<16x128xf32>
    %19 = tpu.matmul %17, %18, %cst_14 {dimension_numbers = #tpu.dot_dimension_numbers<[1], [0], [0], [1], [0, 0, 1, 1], [], []>} : vector<16x128xbf16>, vector<128x128xbf16>, vector<16x128xf32> -> vector<16x128xf32>
    %c0_15 = arith.constant 0 : index
    %c0_16 = arith.constant 0 : index
    %20 = vector.load %arg7[%c0_15, %c0_16] : memref<1x128xf32, #tpu.memory_space<vmem>>, vector<1x128xf32>
    %21 = vector.broadcast %20 : vector<1x128xf32> to vector<16x128xf32>
    %22 = arith.addf %19, %21 : vector<16x128xf32>
    %23 = arith.truncf %22 : vector<16x128xf32> to vector<16x128xbf16>
    %c0_17 = arith.constant 0 : index
    %c0_18 = arith.constant 0 : index
    %24 = vector.load %arg8[%c0_17, %c0_18] : memref<16x128xbf16, #tpu.memory_space<vmem>>, vector<16x128xbf16>
    tpu.vector_store %arg8[%c0_17, %c0_18], %23 {strides = array<i32>} : memref<16x128xbf16, #tpu.memory_space<vmem>>, vector<16x128xbf16>,
    return
  }
  func.func @transform_0(%arg0: i32) -> (i32, i32) {
    %c0_i32 = arith.constant 0 : i32
    %c0_i32_0 = arith.constant 0 : i32
    return %arg0, %c0_i32 : i32, i32
  }
  func.func @transform_1(%arg0: i32) -> (i32, i32) {
    %c0_i32 = arith.constant 0 : i32
    %c0_i32_0 = arith.constant 0 : i32
    %c0_i32_1 = arith.constant 0 : i32
    return %c0_i32, %c0_i32_0 : i32, i32
  }
  func.func @transform_2(%arg0: i32) -> (i32, i32) {
    %c0_i32 = arith.constant 0 : i32
    %c0_i32_0 = arith.constant 0 : i32
    %c0_i32_1 = arith.constant 0 : i32
    return %c0_i32, %c0_i32_0 : i32, i32
  }
  func.func @transform_3(%arg0: i32) -> (i32, i32) {
    %c0_i32 = arith.constant 0 : i32
    %c0_i32_0 = arith.constant 0 : i32
    %c0_i32_1 = arith.constant 0 : i32
    return %c0_i32, %c0_i32_0 : i32, i32
  }
  func.func @transform_4(%arg0: i32) -> (i32, i32) {
    %c0_i32 = arith.constant 0 : i32
    %c0_i32_0 = arith.constant 0 : i32
    %c0_i32_1 = arith.constant 0 : i32
    return %c0_i32, %c0_i32_0 : i32, i32
  }
  func.func @transform_5(%arg0: i32) -> (i32, i32) {
    %c0_i32 = arith.constant 0 : i32
    %c0_i32_0 = arith.constant 0 : i32
    %c0_i32_1 = arith.constant 0 : i32
    return %c0_i32, %c0_i32_0 : i32, i32
  }
  func.func @transform_6(%arg0: i32) -> (i32, i32) {
    %c0_i32 = arith.constant 0 : i32
    %c0_i32_0 = arith.constant 0 : i32
    %c0_i32_1 = arith.constant 0 : i32
    return %c0_i32, %c0_i32_0 : i32, i32
  }
  func.func @transform_7(%arg0: i32) -> (i32, i32) {
    %c0_i32 = arith.constant 0 : i32
    %c0_i32_0 = arith.constant 0 : i32
    return %arg0, %c0_i32 : i32, i32
  }
}

</mosaic_0001>

<bundles_post_ra>
// kernel: _forward_2d.1
= control target key start
LH: loop header
LB: loop body
LE: loop exit
PB: predicated region body
PF: predicated region fallthrough
CT: control target
= control target key end

     0   :  { %12 = vsyncpa [#allocation3], 0  ;;  %s904_s0 = inlined_call_operand.hbm [shape: f32[16,256], index: 0, kind: input, shape index: {}]   ;;  %s905_s1 = inlined_call_operand.hbm [shape: bf16[256,128], index: 1, kind: input, shape index: {}]   ;;  %s906_s2 = inlined_call_operand.vmem [shape: f32[1,128], index: 2, kind: input, shape index: {}]   ;;  %s907_s3 = inlined_call_operand.hbm [shape: bf16[128,128], index: 3, kind: input, shape index: {}]   ;;  %s908_s4 = inlined_call_operand.vmem [shape: f32[1,128], index: 4, kind: input, shape index: {}]   ;;  %s909_s5 = inlined_call_operand.hbm [shape: bf16[128,128], index: 5, kind: input, shape index: {}]   ;;  %s910_s6 = inlined_call_operand.vmem [shape: f32[1,128], index: 6, kind: input, shape index: {}]   ;;  %s911_s7 = inlined_call_operand.hbm [shape: bf16[16,128], index: 7, kind: output, shape index: {}]  }
   0x1   :  { %13 = vsyncpa [#allocation6], 0 }
   0x2   :  { %14 = vsyncpa [#allocation9], 0 }
   0x3   :  { %15 = vsyncpa [#allocation4], 0  ;;  %s799_s24 = smov [#allocation5]  }
   0x4   :  { %s33_s25 = sshll.u32 %s799_s24, 4  ;;  %s34_s25 = int_to_ptr.vmem [resolvable:$true] %s33_s25 }
   0x5   :  { %s699_s26 = scalar_lea.vmem %s34_s25, 2048  ;;  %p704_p1 = scmp.lt.s32.totalorder %s34_s25, %s34_s25 }
   0x6   :  { %p700_p0 = scmp.ne.s32.totalorder %s34_s25, %s699_s26  ;;  %p705_p2 = scmp.lt.s32.totalorder %s699_s26, %s699_s26 }
   0x8   :  { %p706_p3 = por %p705_p2, %p704_p1 }
   0xa   :  { %p707_p4 = pnand %p706_p3, %p700_p0 }
   0xc   :  { %710 = shalt.err (!%p707_p4)
}
   0xd   :  { %s800_s27 = smov 64   ;;  %s801_s28 = smov 4  }
   0xe   :  { %39 = dma.hbm_to_vmem [thread:$0]  %s905_s1, 2048, %s34_s25, [#allocation6], %s800_s27, %s800_s27, %s801_s28  }
   0xf   :  { %s802_s8 = smov [#allocation2]  }
  0x10   :  { %s21_s9 = sshll.u32 %s802_s8, 4  ;;  %s22_s9 = int_to_ptr.vmem [resolvable:$true] %s21_s9 }
  0x11   :  { %s719_s10 = scalar_lea.vmem %s22_s9, 512  ;;  %p724_p6 = scmp.lt.s32.totalorder %s22_s9, %s22_s9 }
  0x12   :  { %p720_p5 = scmp.ne.s32.totalorder %s22_s9, %s719_s10  ;;  %p725_p7 = scmp.lt.s32.totalorder %s719_s10, %s719_s10 }
  0x14   :  { %p726_p8 = por %p725_p7, %p724_p6 }
  0x16   :  { %p727_p9 = pnand %p726_p8, %p720_p5 }
  0x18   :  { %730 = shalt.err (!%p727_p9)
}
  0x19   :  { %s803_s11 = smov 256   ;;  %s804_s12 = smov 16  }
  0x1a   :  { %27 = dma.hbm_to_vmem [thread:$0]  %s904_s0, 512, %s22_s9, [#allocation3], %s803_s11, %s803_s11, %s804_s12  }
  0x1b   :  { %s805_s15 = smov [#allocation7]   ;;  %s806_s17 = smov [#allocation8]  }
  0x1c   :  { %s47_s16 = sshll.u32 %s805_s15, 4  ;;  %s61_s1 = sshll.u32 %s806_s17, 4  ;;  %s48_s16 = int_to_ptr.vmem [resolvable:$true] %s47_s16  ;;  %s62_s1 = int_to_ptr.vmem [resolvable:$true] %s61_s1 }
  0x1d   :  { %s739_s18 = scalar_lea.vmem %s48_s16, 1024  ;;  %p744_p11 = scmp.lt.s32.totalorder %s48_s16, %s48_s16 }
  0x1e   :  { %p740_p10 = scmp.ne.s32.totalorder %s48_s16, %s739_s18  ;;  %p745_p12 = scmp.lt.s32.totalorder %s739_s18, %s739_s18 }
  0x20   :  { %p746_p13 = por %p745_p12, %p744_p11 }
  0x22   :  { %p747_p0 = pnand %p746_p13, %p740_p10 }
  0x24   :  { %750 = shalt.err (!%p747_p0)
}
  0x25   :  { %53 = dma.hbm_to_vmem [thread:$0]  %s907_s3, 1024, %s48_s16, [#allocation6], %s800_s27, %s800_s27, %s801_s28  }
  0x26   :  { %s759_s0 = scalar_lea.vmem %s62_s1, 1024  ;;  %p764_p2 = scmp.lt.s32.totalorder %s62_s1, %s62_s1 }
  0x27   :  { %p760_p1 = scmp.ne.s32.totalorder %s62_s1, %s759_s0  ;;  %p765_p3 = scmp.lt.s32.totalorder %s759_s0, %s759_s0 }
  0x29   :  { %p766_p4 = por %p765_p3, %p764_p2 }
  0x2b   :  { %p767_p5 = pnand %p766_p4, %p760_p1 }
  0x2d   :  { %770 = shalt.err (!%p767_p5)
}
  0x2e   :  { %67 = dma.hbm_to_vmem [thread:$0]  %s909_s5, 1024, %s62_s1, [#allocation9], %s800_s27, %s800_s27, %s801_s28  }
  0x2f   :  { %791 = dma.done.wait [#allocation3], 512  }
  0x30   :  { %792 = vsyncadd [#allocation3], 4294966784 }
  0x31   :  { %793 = dma.done.wait [#allocation6], 3072  }
  0x32   :  { %794 = vsyncadd [#allocation6], 4294964224 }
  0x33   :  { %795 = dma.done.wait [#allocation9], 1024  }
  0x34   :  { %796 = vsyncadd [#allocation9], 4294966272  ;;  %v807_v0 = vmov 0.0   ;;  %v659_v1 = vld [vmem:[#allocation5 + $0x78] sm:$0xff]   ;;  %v661_v3 = vld [vmem:[#allocation5 + $0x70] sm:$0xff]   ;;  %vm808_vm0 = vmmov 0  }
  0x35   :  { %608 = vmatprep.subr.bf16.mxu1 %v807_v0  ;;  %v660_v2 = vld [vmem:[#allocation5 + $0x38] sm:$0xff]   ;;  %568 = vmatprep.subr.bf16.mxu0 %v659_v1  ;;  %v662_v4 = vld [vmem:[#allocation5 + $0x30] sm:$0xff]   ;;  %v663_v5 = vld [vmem:[#allocation5 + $0x68] sm:$0xff]   ;;  %s809_s26 = smov [#allocation10]  }
  0x36   :  { %569 = vmatpush3.bf16.msra.mxu0 %v660_v2  ;;  %v664_v6 = vld [vmem:[#allocation5 + $0x28] sm:$0xff]   ;;  %v665_v7 = vld [vmem:[#allocation5 + $0x60] sm:$0xff]   ;;  %v667_v9 = vld [vmem:[#allocation5 + $0x58] sm:$0xff]   ;;  %624 = vmatprep.mubr.msk.bf16.mxu1 %vm808_vm0, %v807_v0  ;;  %s510_s29 = sshll.u32 %s809_s26, 4  ;;  %s511_s29 = int_to_ptr.vmem [resolvable:$true] %s510_s29 }
  0x37   :  { %570 = vmatprep.subr.bf16.mxu0 %v661_v3  ;;  %v666_v8 = vld [vmem:[#allocation5 + $0x20] sm:$0xff]   ;;  %v668_v10 = vld [vmem:[#allocation5 + $0x18] sm:$0xff]   ;;  %v669_v11 = vld [vmem:[#allocation5 + $0x50] sm:$0xff]   ;;  %p776_p7 = scmp.lt.s32.totalorder %s511_s29, %s511_s29 }
  0x38   :  { %v84_v12 = vld [vmem:[#allocation2 + $0x8] sm:$0xff]  ;;  %v86_v13 = vld [vmem:[#allocation2 + $0x18] sm:$0xff]  ;;  %v670_v14 = vld [vmem:[#allocation5 + $0x10] sm:$0xff]  }
  0x39   :  { %v88_v15 = vpack.c.bf16 %v86_v13, %v84_v12  ;;  %v675_v16 = vld [vmem:[#allocation7 + $0x38] sm:$0xff]   ;;  %v671_v17 = vld [vmem:[#allocation5 + $0x48] sm:$0xff]   ;;  %v676_v18 = vld [vmem:[#allocation7 + $0x30] sm:$0xff]  }
  0x3a   :  { %571 = vmatpush3.bf16.msra.mxu0 %v662_v4  ;;  %609 = vmatpush3.bf16.msra.mxu1 %v675_v16  ;;  %v672_v19 = vld [vmem:[#allocation5 + $0x8] sm:$0xff]   ;;  %v673_v20 = vld [vmem:[#allocation5 + $0x40] sm:$0xff]   ;;  %v85_v24 = vld [vmem:[#allocation2 + $0x10] sm:$0xff] }
  0x3b   :  { %572 = vmatprep.subr.bf16.mxu0 %v663_v5  ;;  %256 = vmatprep.mubr.bf16.mxu0 %v88_v15  ;;  %v677_v21 = vld [vmem:[#allocation7 + $0x28] sm:$0xff]   ;;  %v674_v22 = vld [vmem:[#allocation5] sm:$0xff]   ;;  %v679_v27 = vld [vmem:[#allocation7 + $0x18] sm:$0xff]  }
  0x3c   :  { %610 = vmatprep.subr.bf16.mxu1 %v807_v0  ;;  %v83_v23 = vld [vmem:[#allocation2] sm:$0xff]  ;;  %v680_v28 = vld [vmem:[#allocation7 + $0x10] sm:$0xff]   ;;  %v681_v29 = vld [vmem:[#allocation7 + $0x8] sm:$0xff]  }
  0x3d   :  { %v678_v25 = vld [vmem:[#allocation7 + $0x20] sm:$0xff]   ;;  %v87_v26 = vpack.c.bf16 %v85_v24, %v83_v23  ;;  %v683_v31 = vld [vmem:[#allocation8 + $0x38] sm:$0xff]   ;;  %v684_v32 = vld [vmem:[#allocation8 + $0x30] sm:$0xff]  }
  0x3e   :  { %573 = vmatpush3.bf16.msra.mxu0 %v664_v6  ;;  %611 = vmatpush3.bf16.msra.mxu1 %v676_v18  ;;  %v682_v30 = vld [vmem:[#allocation7] sm:$0xff]   ;;  %v685_v33 = vld [vmem:[#allocation8 + $0x28] sm:$0xff]   ;;  %v687_v35 = vld [vmem:[#allocation8 + $0x18] sm:$0xff]  }
  0x3f   :  { %574 = vmatprep.subr.bf16.mxu0 %v665_v7  ;;  %612 = vmatprep.subr.bf16.mxu1 %v807_v0  ;;  %v686_v34 = vld [vmem:[#allocation8 + $0x20] sm:$0xff]   ;;  %v688_v48 = vld [vmem:[#allocation8 + $0x10] sm:$0xff]   ;;  %v689_v49 = vld [vmem:[#allocation8 + $0x8] sm:$0xff]  }
  0x40   :  { %v524_v39 = vld [vmem:[%s906_s2] ss:$0 sm:$0xff] }
  0x41   :  { %v690_v50 = vld [vmem:[#allocation8] sm:$0xff]  }
  0x42   :  { %575 = vmatpush3.bf16.msra.mxu0 %v666_v8  ;;  %613 = vmatpush3.bf16.msra.mxu1 %v677_v21  ;;  %v541_v51 = vld [vmem:[%s908_s4] ss:$0 sm:$0xff]  ;;  %s771_s4 = scalar_lea.vmem %s511_s29, 128 }
  0x43   :  { %576 = vmatprep.subr.bf16.mxu0 %v667_v9  ;;  %614 = vmatprep.subr.bf16.mxu1 %v807_v0  ;;  %v550_v62 = vld [vmem:[%s910_s6] ss:$0 sm:$0xff]  ;;  %p772_p6 = scmp.ne.s32.totalorder %s511_s29, %s771_s4  ;;  %p777_p8 = scmp.lt.s32.totalorder %s771_s4, %s771_s4 }
  0x45   :  { %p778_p9 = por %p777_p8, %p776_p7 }
  0x46   :  { %577 = vmatpush3.bf16.msra.mxu0 %v668_v10  ;;  %615 = vmatpush3.bf16.msra.mxu1 %v678_v25 }
  0x47   :  { %578 = vmatprep.subr.bf16.mxu0 %v669_v11  ;;  %616 = vmatprep.subr.bf16.mxu1 %v807_v0  ;;  %p779_p10 = pnand %p778_p9, %p772_p6 }
  0x4a   :  { %579 = vmatpush3.bf16.msra.mxu0 %v670_v14  ;;  %617 = vmatpush3.bf16.msra.mxu1 %v679_v27 }
  0x4b   :  { %580 = vmatprep.subr.bf16.mxu0 %v671_v17  ;;  %618 = vmatprep.subr.bf16.mxu1 %v807_v0 }
  0x4e   :  { %581 = vmatpush3.bf16.msra.mxu0 %v672_v19  ;;  %619 = vmatpush3.bf16.msra.mxu1 %v680_v28 }
  0x4f   :  { %582 = vmatprep.subr.bf16.mxu0 %v673_v20  ;;  %620 = vmatprep.subr.bf16.mxu1 %v807_v0 }
  0x52   :  { %583 = vmatpush3.bf16.msra.mxu0 %v674_v22  ;;  %621 = vmatpush3.bf16.msra.mxu1 %v681_v29 }
  0x53   :  { %628 = vmatprep.subr.bf16.mxu0 %v807_v0  ;;  %622 = vmatprep.subr.bf16.mxu1 %v807_v0 }
  0x55   :  { %257 = vmatmul.mubr.bf16.vlgmr.msra.gmra.mxu0 %v87_v26 }
  0x56   :  { %623 = vmatpush3.bf16.msra.mxu1 %v682_v30  ;;  %644 = vmatprep.mubr.msk.bf16.mxu0 %vm808_vm0, %v807_v0 }
  0x57   :  { %629 = vmatpush3.bf16.msra.mxu0 %v683_v31 }
  0x58   :  { %630 = vmatprep.subr.bf16.mxu0 %v807_v0 }
  0x5b   :  { %631 = vmatpush3.bf16.msra.mxu0 %v684_v32 }
  0x5c   :  { %632 = vmatprep.subr.bf16.mxu0 %v807_v0 }
  0x5f   :  { %633 = vmatpush3.bf16.msra.mxu0 %v685_v33 }
  0x60   :  { %634 = vmatprep.subr.bf16.mxu0 %v807_v0 }
  0x63   :  { %635 = vmatpush3.bf16.msra.mxu0 %v686_v34 }
  0x64   :  { %636 = vmatprep.subr.bf16.mxu0 %v807_v0 }
  0x67   :  { %637 = vmatpush3.bf16.msra.mxu0 %v687_v35 }
  0x68   :  { %638 = vmatprep.subr.bf16.mxu0 %v807_v0 }
  0x6b   :  { %639 = vmatpush3.bf16.msra.mxu0 %v688_v48 }
  0x6c   :  { %640 = vmatprep.subr.bf16.mxu0 %v807_v0 }
  0x6f   :  { %641 = vmatpush3.bf16.msra.mxu0 %v689_v49 }
  0x70   :  { %642 = vmatprep.subr.bf16.mxu0 %v807_v0 }
  0x73   :  { %643 = vmatpush3.bf16.msra.mxu0 %v690_v50 }
 0x115   :  { %v584_v36 = vpop.f32.mrf.mxu0 }
 0x117   :  { %v585_v37 = vpop.f32.mrf.mxu0 }
 0x118   :  { %v586_v38 = vadd.f32 %v585_v37, %v584_v36 }
 0x119   :  { %v587_v40 = vpop.f32.mrf.mxu0 }
 0x11a   :  { %v259_v42 = vadd.f32 %v586_v38, %v524_v39 }
 0x11b   :  { %v588_v41 = vpop.f32.mrf.mxu0 }
 0x11c   :  { %v589_v43 = vadd.f32 %v588_v41, %v587_v40  ;;  %v265_v45 = vmax.f32 %v259_v42, 0.0 }
 0x11e   :  { %v262_v44 = vadd.f32 %v589_v43, %v524_v39 }
 0x120   :  { %v266_v46 = vmax.f32 %v262_v44, 0.0 }
 0x122   :  { %v267_v47 = vpack.c.bf16 %v266_v46, %v265_v45 }
 0x124   :  { %625 = vmatmul.mubr.bf16.vlgmr.msra.gmra.mxu1 %v267_v47 }
 0x1e4   :  { %v373_v52 = vpop.f32.mrf.mxu1 }
 0x1e5   :  { %v374_v54 = vadd.f32 %v541_v51, %v373_v52 }
 0x1e6   :  { %v626_v53 = vpop.f32.mrf.mxu1 }
 0x1e7   :  { %v380_v58 = vmax.f32 %v374_v54, 0.0 }
 0x1e8   :  { %v376_v55 = vpop.f32.mrf.mxu1 }
 0x1e9   :  { %v377_v56 = vadd.f32 %v541_v51, %v376_v55 }
 0x1ea   :  { %v627_v57 = vpop.f32.mrf.mxu1 }
 0x1eb   :  { %v381_v59 = vmax.f32 %v377_v56, 0.0 }
 0x1ed   :  { %v382_v60 = vpack.c.bf16 %v381_v59, %v380_v58 }
 0x1ef   :  { %645 = vmatmul.mubr.bf16.vlgmr.msra.gmra.mxu0 %v382_v60 }
 0x2af   :  { %v488_v61 = vpop.f32.mrf.mxu0 }
 0x2b0   :  { %v489_v1 = vadd.f32 %v550_v62, %v488_v61 }
 0x2b1   :  { %v646_v63 = vpop.f32.mrf.mxu0 }
 0x2b3   :  { %v491_v0 = vpop.f32.mrf.mxu0 }
 0x2b4   :  { %v492_v2 = vadd.f32 %v550_v62, %v491_v0 }
 0x2b5   :  { %v647_v3 = vpop.f32.mrf.mxu0 }
 0x2b6   :  { %v566_v4 = vpack.c.bf16 %v492_v2, %v489_v1 }
 0x2b8   :  { %567 = vst [vmem:[#allocation10] sm:$0xff] %v566_v4  }
 0x2b9   :  { %782 = shalt.err (!%p779_p10)
}
 0x2ba   :  { %516 = dma.vmem_to_hbm [thread:$0]  %s511_s29, 128, %s911_s7, [#allocation4], %s800_s27, %s800_s27, %s801_s28  }
 0x2bb   :  { %797 = dma.done.wait [#allocation4], 128  }
 0x2bc   :  { %798 = vsyncadd [#allocation4], 4294967168 }
 0x2bd   :  { %520 = vsyncpa [#allocation3], 1 }
 0x2be   :  { %521 = vsyncpa [#allocation6], 1 }
 0x2bf   :  { %522 = vsyncpa [#allocation9], 1 }
 0x2c0   :  { %523 = vsyncpa [#allocation4], 1 }

</bundles_post_ra>
